<compile_context>
chip_gen: v7x
topology: tpu7x:2x2x1
jax: 0.10.0
libtpu: 0.0.40
codegen_flags: <defaults>
</compile_context>

<pallas_src>
import functools

import jax
import jax.numpy as jnp
from jax import lax
from jax.experimental import pallas as pl
from jax.experimental.pallas import tpu as pltpu


def _round_up(x, m):
    return (x + m - 1) // m * m


def _layer_norm(y, w, b, d_model, eps=1e-5):
    # Lane-padded LayerNorm: pad columns of y are exactly zero and gamma/beta are zero-padded,
    # so sums over the padded width equal sums over the real d_model columns and the padded
    # output columns stay exactly zero.  Uses E[y^2] - mu^2 (biased variance, matches PyTorch).
    inv_d = 1.0 / d_model
    mu = jnp.sum(y, axis=-1, keepdims=True) * inv_d
    ms = jnp.sum(y * y, axis=-1, keepdims=True) * inv_d
    var = jnp.maximum(ms - mu * mu, 0.0)
    return (y - mu) * lax.rsqrt(var + eps) * w + b


def _layer_math(x, w_attn, w_ff1, w_ff2, vecs, *, d_model):
    """One post-LN encoder layer (ReLU, eval-mode dropout) on an f32 activation tile."""
    d_pad = x.shape[-1]
    f_pad = w_ff1.shape[-1]
    mm = w_attn.dtype  # bf16 weights -> bf16 MXU inputs, f32 accumulation

    attn_b = vecs[0:1, :d_pad]
    ln1_w, ln1_b = vecs[1:2, :d_pad], vecs[2:3, :d_pad]
    ln2_w, ln2_b = vecs[3:4, :d_pad], vecs[4:5, :d_pad]
    ff2_b = vecs[5:6, :d_pad]
    ff1_b = vecs[6:7, :f_pad]

    # Self-attention with a single key: softmax is identity, V-proj/out-proj pre-folded.
    attn = jnp.dot(x.astype(mm), w_attn, preferred_element_type=jnp.float32) + attn_b
    x = _layer_norm(x + attn, ln1_w, ln1_b, d_model)

    h = jnp.dot(x.astype(mm), w_ff1, preferred_element_type=jnp.float32) + ff1_b
    h = jnp.maximum(h, 0.0)
    ff = jnp.dot(h.astype(mm), w_ff2, preferred_element_type=jnp.float32) + ff2_b
    x = _layer_norm(x + ff, ln2_w, ln2_b, d_model)
    return x


def _resident_kernel(src_ref, aw_ref, f1_ref, f2_ref, vec_ref, fcw_ref, fcb_ref,
                     o_ref, *, d_model, num_layers):
    """Whole weight stack resident in VMEM; grid over batch tiles only; layer loop in-kernel."""
    x0 = src_ref[...].astype(jnp.float32)

    def body(l, x):
        return _layer_math(x, aw_ref[l], f1_ref[l], f2_ref[l], vec_ref[l], d_model=d_model)

    x = lax.fori_loop(0, num_layers, body, x0, unroll=num_layers <= 4)

    out = jnp.dot(x.astype(fcw_ref.dtype), fcw_ref[...],
                  preferred_element_type=jnp.float32) + fcb_ref[...]
    o_ref[...] = out.astype(o_ref.dtype)


def _stream_kernel(src_ref, aw_ref, f1_ref, f2_ref, vec_ref, o_ref, x_sc, *, d_model):
    """Layer-outer streaming path: weights DMA'd once per layer, activations persist in VMEM."""
    l = pl.program_id(0)
    b = pl.program_id(1)

    @pl.when(l == 0)
    def _():
        x_sc[b] = src_ref[...].astype(jnp.float32)

    x = _layer_math(x_sc[b], aw_ref[0], f1_ref[0], f2_ref[0], vec_ref[0], d_model=d_model)
    x_sc[b] = x
    o_ref[...] = x.astype(o_ref.dtype)   # only the last-layer writeback survives in HBM


def transformer_encoder_model(src, kp, *, output_dim):
    """src: (B, d_model) float32 -> (B, output_dim) float32."""
    B, d_model = src.shape
    L, d_pad, _ = kp["attn_w"].shape
    f_pad = kp["ff1_w"].shape[2]
    v_pad = kp["vecs"].shape[2]
    out_pad = kp["fc_w"].shape[1]
    wbytes = jnp.dtype(kp["attn_w"].dtype).itemsize

    # Batch tiling: 256-row tiles for big batches (v6e/v7x MXU), >=2 tiles when possible so both
    # v7x TensorCores get work, minimum sublane granularity of 8.
    if B >= 512:
        tile_b = 256
    elif B >= 256:
        tile_b = 128
    elif B >= 16:
        tile_b = _round_up(-(-B // 2), 8)
    else:
        tile_b = _round_up(max(B, 1), 8)
    b_pad = _round_up(B, tile_b)
    n_bt = b_pad // tile_b

    src_p = src
    if (b_pad, d_pad) != (B, d_model):
        src_p = jnp.pad(src, ((0, b_pad - B), (0, d_pad - d_model)))

    # Generation-aware VMEM capacity (v5e/v6e: 128 MiB, v7x: 64 MiB per core).
    try:
        vmem_cap = int(pltpu.get_tpu_info().vmem_capacity_bytes)
    except Exception:
        vmem_cap = 64 << 20

    layer_w_bytes = wbytes * (d_pad * d_pad + 2 * d_pad * f_pad) + 4 * 8 * v_pad
    fc_bytes = wbytes * d_pad * out_pad + 4 * out_pad
    act_tile_bytes = 4 * tile_b * (3 * d_pad + f_pad + out_pad)   # io tiles + x/h/attn temporaries

    resident_need = 2 * (L * layer_w_bytes + fc_bytes) + 2 * act_tile_bytes
    use_resident = resident_need <= int(0.75 * vmem_cap)

    if use_resident:
        vmem_limit = min(max(int(1.25 * resident_need), 8 << 20), int(0.9 * vmem_cap))
        kernel = functools.partial(_resident_kernel, d_model=d_model, num_layers=L)
        out = pl.pallas_call(
            kernel,
            out_shape=jax.ShapeDtypeStruct((b_pad, out_pad), src.dtype),
            grid_spec=pltpu.PrefetchScalarGridSpec(
                num_scalar_prefetch=0,
                grid=(n_bt,),
                in_specs=[
                    pl.BlockSpec((tile_b, d_pad), lambda b: (b, 0)),        # activations (streamed)
                    pl.BlockSpec((L, d_pad, d_pad), lambda b: (0, 0, 0)),   # folded V@out-proj (resident)
                    pl.BlockSpec((L, d_pad, f_pad), lambda b: (0, 0, 0)),   # ff1 weights (resident)
                    pl.BlockSpec((L, f_pad, d_pad), lambda b: (0, 0, 0)),   # ff2 weights (resident)
                    pl.BlockSpec((L, 8, v_pad), lambda b: (0, 0, 0)),       # packed bias/LN slab
                    pl.BlockSpec((d_pad, out_pad), lambda b: (0, 0)),       # fc_out weight
                    pl.BlockSpec((1, out_pad), lambda b: (0, 0)),           # fc_out bias
                ],
                out_specs=pl.BlockSpec((tile_b, out_pad), lambda b: (b, 0)),
            ),
            compiler_params=pltpu.CompilerParams(
                dimension_semantics=("parallel",),
                vmem_limit_bytes=vmem_limit,
            ),
        )(src_p, kp["attn_w"], kp["ff1_w"], kp["ff2_w"], kp["vecs"], kp["fc_w"], kp["fc_b"])
        return out[:B, :output_dim]

    # Fallback: weight stack too large for VMEM.  Layer-outer grid so each layer's weights are
    # DMA'd exactly once; full padded-batch activations persist in a VMEM scratch.
    # TODO(synk): if 4*b_pad*d_pad itself exceeds VMEM, chunk the batch at the wrapper level.
    stream_need = (2 * (layer_w_bytes + 8 * 4 * tile_b * d_pad)
                   + 4 * b_pad * d_pad + act_tile_bytes)
    vmem_limit = min(max(int(1.25 * stream_need), 8 << 20), int(0.9 * vmem_cap))
    kernel = functools.partial(_stream_kernel, d_model=d_model)
    enc = pl.pallas_call(
        kernel,
        out_shape=jax.ShapeDtypeStruct((b_pad, d_pad), src.dtype),
        grid_spec=pltpu.PrefetchScalarGridSpec(
            num_scalar_prefetch=0,
            grid=(L, n_bt),
            in_specs=[
                pl.BlockSpec((tile_b, d_pad), lambda l, b: (b, 0)),
                pl.BlockSpec((1, d_pad, d_pad), lambda l, b: (l, 0, 0)),
                pl.BlockSpec((1, d_pad, f_pad), lambda l, b: (l, 0, 0)),
                pl.BlockSpec((1, f_pad, d_pad), lambda l, b: (l, 0, 0)),
                pl.BlockSpec((1, 8, v_pad), lambda l, b: (l, 0, 0)),
            ],
            out_specs=pl.BlockSpec((tile_b, d_pad), lambda l, b: (b, 0)),
            scratch_shapes=[pltpu.VMEM((n_bt, tile_b, d_pad), jnp.float32)],
        ),
        compiler_params=pltpu.CompilerParams(
            # Layer axis is a sequential dependency; batch left "arbitrary" because the persistent
            # activation scratch is indexed by batch tile (megacore split handled by resident path).
            dimension_semantics=("arbitrary", "arbitrary"),
            vmem_limit_bytes=vmem_limit,
        ),
    )(src_p, kp["attn_w"], kp["ff1_w"], kp["ff2_w"], kp["vecs"])
    # Final fc_out as a plain XLA matmul - kept out of the pipelined layer loop (v7x VMEM budget).
    out = jnp.dot(enc[:B].astype(kp["fc_w"].dtype), kp["fc_w"],
                  preferred_element_type=jnp.float32) + kp["fc_b"]
    return out[:, :output_dim].astype(src.dtype)


def init_torch_layout_params(key, *, num_layers, d_model, dim_feedforward, output_dim):
    """Deterministic synthetic parameters in PyTorch state_dict layout ((out, in) weights)."""
    L, D, F, O = num_layers, d_model, dim_feedforward, output_dim
    ks = jax.random.split(key, 10)
    s = 0.05
    return {
        "in_proj_weight": s * jax.random.normal(ks[0], (L, 3 * D, D), jnp.float32),
        "in_proj_bias":   s * jax.random.normal(ks[1], (L, 3 * D), jnp.float32),
        "out_proj_weight": s * jax.random.normal(ks[2], (L, D, D), jnp.float32),
        "out_proj_bias":   s * jax.random.normal(ks[3], (L, D), jnp.float32),
        "ln1_weight": jnp.ones((L, D), jnp.float32),
        "ln1_bias":   jnp.zeros((L, D), jnp.float32),
        "ln2_weight": jnp.ones((L, D), jnp.float32),
        "ln2_bias":   jnp.zeros((L, D), jnp.float32),
        "linear1_weight": s * jax.random.normal(ks[4], (L, F, D), jnp.float32),
        "linear1_bias":   s * jax.random.normal(ks[5], (L, F), jnp.float32),
        "linear2_weight": s * jax.random.normal(ks[6], (L, D, F), jnp.float32),
        "linear2_bias":   s * jax.random.normal(ks[7], (L, D), jnp.float32),
        "fc_weight": s * jax.random.normal(ks[8], (O, D), jnp.float32),
        "fc_bias":   s * jax.random.normal(ks[9], (O,), jnp.float32),
    }


def prepare_kernel_params(p, *, weight_dtype=jnp.bfloat16):
    """Fold V/out-proj, transpose to (in, out), pad everything lane-dense, pack small vectors."""
    L, _, D = p["in_proj_weight"].shape
    F = p["linear1_weight"].shape[1]
    O = p["fc_weight"].shape[0]

    d_pad = max(128, _round_up(D, 128))
    f_pad = max(128, _round_up(F, 128))
    out_pad = max(128, _round_up(O, 128))
    v_pad = max(d_pad, f_pad)

    # seq_len == 1: attn(x) = x @ (Wv^T Wo^T) + (b_v Wo^T + b_o); fold in f32 (Q/K never used).
    w_v = p["in_proj_weight"][:, 2 * D:, :]                     # (L, D, D) (out, in)
    b_v = p["in_proj_bias"][:, 2 * D:]                          # (L, D)
    w_o = p["out_proj_weight"]                                  # (L, D, D) (out, in)
    attn_w = jnp.einsum("lov,lvi->lio", w_o, w_v, precision="highest")   # (L, D_in, D_out)
    attn_b = jnp.einsum("lv,lov->lo", b_v, w_o, precision="highest") + p["out_proj_bias"]

    def pad2(a, r, c):   # zero-pad last two dims of (L, r0, c0) -> (L, r, c)
        return jnp.pad(a, ((0, 0), (0, r - a.shape[1]), (0, c - a.shape[2])))

    def padv(a, c):      # zero-pad (L, c0) -> (L, c); zeros keep padded lanes inert (incl. LN gamma)
        return jnp.pad(a, ((0, 0), (0, c - a.shape[1])))

    # Pack the 8 tiny per-layer vectors into one (L, 8, v_pad) f32 slab -> one DMA per layer.
    vecs = jnp.stack([
        padv(attn_b, v_pad),
        padv(p["ln1_weight"], v_pad), padv(p["ln1_bias"], v_pad),
        padv(p["ln2_weight"], v_pad), padv(p["ln2_bias"], v_pad),
        padv(p["linear2_bias"], v_pad),
        padv(p["linear1_bias"], v_pad),
        jnp.zeros((L, v_pad), jnp.float32),
    ], axis=1)

    fc_w = jnp.pad(jnp.swapaxes(p["fc_weight"], 0, 1), ((0, d_pad - D), (0, out_pad - O)))
    fc_b = jnp.pad(p["fc_bias"], (0, out_pad - O)).reshape(1, out_pad)

    return {
        "attn_w": pad2(attn_w, d_pad, d_pad).astype(weight_dtype),
        "ff1_w": pad2(jnp.swapaxes(p["linear1_weight"], 1, 2), d_pad, f_pad).astype(weight_dtype),
        "ff2_w": pad2(jnp.swapaxes(p["linear2_weight"], 1, 2), f_pad, d_pad).astype(weight_dtype),
        "vecs": vecs.astype(jnp.float32),
        "fc_w": fc_w.astype(weight_dtype),
        "fc_b": fc_b.astype(jnp.float32),
    }


def reference_forward(src, p, eps=1e-5):
    """Pure-JAX f32 reference for the PyTorch module (post-LN, ReLU, eval-mode dropout)."""
    L, _, D = p["in_proj_weight"].shape

    def ln(y, w, b):
        mu = jnp.mean(y, axis=-1, keepdims=True)
        var = jnp.mean((y - mu) ** 2, axis=-1, keepdims=True)
        return (y - mu) / jnp.sqrt(var + eps) * w + b

    x = src
    for l in range(L):
        w_v = p["in_proj_weight"][l, 2 * D:, :]
        b_v = p["in_proj_bias"][l, 2 * D:]
        attn = (x @ w_v.T + b_v) @ p["out_proj_weight"][l].T + p["out_proj_bias"][l]
        x = ln(x + attn, p["ln1_weight"][l], p["ln1_bias"][l])
        h = jnp.maximum(x @ p["linear1_weight"][l].T + p["linear1_bias"][l], 0.0)
        ff = h @ p["linear2_weight"][l].T + p["linear2_bias"][l]
        x = ln(x + ff, p["ln2_weight"][l], p["ln2_bias"][l])
    return x @ p["fc_weight"].T + p["fc_bias"]


if __name__ == "__main__":
    # Small shapes consistent with the module's forward (src: (B, input_dim)).
    B = 8
    input_dim = 32          # d_model
    output_dim = 16
    dim_feedforward = 64
    num_encoder_layers = 2
    # nhead is irrelevant while seq_len == 1 (softmax over a single key is identity).

    key = jax.random.PRNGKey(0)
    k_src, k_params = jax.random.split(key)
    src = jax.random.normal(k_src, (B, input_dim), jnp.float32)

    torch_params = init_torch_layout_params(
        k_params, num_layers=num_encoder_layers, d_model=input_dim,
        dim_feedforward=dim_feedforward, output_dim=output_dim)
    kparams = prepare_kernel_params(torch_params, weight_dtype=jnp.bfloat16)

    out = transformer_encoder_model(src, kparams, output_dim=output_dim)
    out = jax.block_until_ready(out)

    ref = reference_forward(src, torch_params)
    max_diff = float(jnp.max(jnp.abs(out - ref)))

    assert out.shape == (B, output_dim)
    assert bool(jnp.all(jnp.isfinite(out)))
    # bf16 weights / bf16 MXU inputs with f32 accumulation -> loose tolerance vs f32 reference.
    assert max_diff < 5e-2, f"max |kernel - reference| = {max_diff}"
    # TODO(synk): dropout layers are identity here (inference/eval semantics).
    print("KERNEL_OK")
</pallas_src>

<mosaic_0001>
module attributes {stable_mosaic.version = 11 : i64} {
  func.func @_resident_kernel(%arg0: i32, %arg1: memref<8x128xf32, #tpu.memory_space<vmem>>, %arg2: memref<2x128x128xbf16, #tpu.memory_space<vmem>>, %arg3: memref<2x128x128xbf16, #tpu.memory_space<vmem>>, %arg4: memref<2x128x128xbf16, #tpu.memory_space<vmem>>, %arg5: memref<2x8x128xf32, #tpu.memory_space<vmem>>, %arg6: memref<128x128xbf16, #tpu.memory_space<vmem>>, %arg7: memref<1x128xf32, #tpu.memory_space<vmem>>, %arg8: memref<8x128xf32, #tpu.memory_space<vmem>>) attributes {dimension_semantics = [#tpu.dimension_semantics<parallel>], iteration_bounds = array<i64: 1>, scalar_prefetch = 0 : i64, scratch_operands = 0 : i64, tpu.core_type = #tpu.core_type<tc>, window_params = [{transform_indices = @transform_0, window_bounds = array<i64: 8, 128>}, {pipeline_mode = #tpu.pipeline_mode<synchronous>, transform_indices = @transform_1, window_bounds = array<i64: 2, 128, 128>}, {pipeline_mode = #tpu.pipeline_mode<synchronous>, transform_indices = @transform_2, window_bounds = array<i64: 2, 128, 128>}, {pipeline_mode = #tpu.pipeline_mode<synchronous>, transform_indices = @transform_3, window_bounds = array<i64: 2, 128, 128>}, {pipeline_mode = #tpu.pipeline_mode<synchronous>, transform_indices = @transform_4, window_bounds = array<i64: 2, 8, 128>}, {pipeline_mode = #tpu.pipeline_mode<synchronous>, transform_indices = @transform_5, window_bounds = array<i64: 128, 128>}, {pipeline_mode = #tpu.pipeline_mode<synchronous>, transform_indices = @transform_6, window_bounds = array<i64: 1, 128>}, {transform_indices = @transform_7, window_bounds = array<i64: 8, 128>}]} {
    %c0 = arith.constant 0 : index
    %c0_0 = arith.constant 0 : index
    %0 = vector.load %arg1[%c0, %c0_0] : memref<8x128xf32, #tpu.memory_space<vmem>>, vector<8x128xf32>
    %c0_i32 = arith.constant 0 : i32
    %1 = arith.index_cast %c0_i32 : i32 to index
    %c0_1 = arith.constant 0 : index
    %c0_2 = arith.constant 0 : index
    %2 = vector.load %arg2[%1, %c0_1, %c0_2] : memref<2x128x128xbf16, #tpu.memory_space<vmem>>, vector<1x128x128xbf16>
    %3 = vector.shape_cast %2 : vector<1x128x128xbf16> to vector<128x128xbf16>
    %4 = arith.index_cast %c0_i32 : i32 to index
    %c0_3 = arith.constant 0 : index
    %c0_4 = arith.constant 0 : index
    %5 = vector.load %arg3[%4, %c0_3, %c0_4] : memref<2x128x128xbf16, #tpu.memory_space<vmem>>, vector<1x128x128xbf16>
    %6 = vector.shape_cast %5 : vector<1x128x128xbf16> to vector<128x128xbf16>
    %7 = arith.index_cast %c0_i32 : i32 to index
    %c0_5 = arith.constant 0 : index
    %c0_6 = arith.constant 0 : index
    %8 = vector.load %arg4[%7, %c0_5, %c0_6] : memref<2x128x128xbf16, #tpu.memory_space<vmem>>, vector<1x128x128xbf16>
    %9 = vector.shape_cast %8 : vector<1x128x128xbf16> to vector<128x128xbf16>
    %10 = arith.index_cast %c0_i32 : i32 to index
    %c0_7 = arith.constant 0 : index
    %c0_8 = arith.constant 0 : index
    %11 = vector.load %arg5[%10, %c0_7, %c0_8] : memref<2x8x128xf32, #tpu.memory_space<vmem>>, vector<1x8x128xf32>
    %12 = vector.shape_cast %11 : vector<1x8x128xf32> to vector<8x128xf32>
    %13 = vector.extract_strided_slice %12 {offsets = [0, 0], sizes = [1, 128], strides = [1, 1]} : vector<8x128xf32> to vector<1x128xf32>
    %14 = vector.extract_strided_slice %12 {offsets = [1, 0], sizes = [1, 128], strides = [1, 1]} : vector<8x128xf32> to vector<1x128xf32>
    %15 = vector.extract_strided_slice %12 {offsets = [2, 0], sizes = [1, 128], strides = [1, 1]} : vector<8x128xf32> to vector<1x128xf32>
    %16 = vector.extract_strided_slice %12 {offsets = [3, 0], sizes = [1, 128], strides = [1, 1]} : vector<8x128xf32> to vector<1x128xf32>
    %17 = vector.extract_strided_slice %12 {offsets = [4, 0], sizes = [1, 128], strides = [1, 1]} : vector<8x128xf32> to vector<1x128xf32>
    %18 = vector.extract_strided_slice %12 {offsets = [5, 0], sizes = [1, 128], strides = [1, 1]} : vector<8x128xf32> to vector<1x128xf32>
    %19 = vector.extract_strided_slice %12 {offsets = [6, 0], sizes = [1, 128], strides = [1, 1]} : vector<8x128xf32> to vector<1x128xf32>
    %20 = arith.truncf %0 : vector<8x128xf32> to vector<8x128xbf16>
    %cst = arith.constant dense<0.000000e+00> : vector<8x128xf32>
    %21 = tpu.matmul %20, %3, %cst {dimension_numbers = #tpu.dot_dimension_numbers<[1], [0], [0], [1], [0, 0, 1, 1], [], []>} : vector<8x128xbf16>, vector<128x128xbf16>, vector<8x128xf32> -> vector<8x128xf32>
    %22 = vector.broadcast %13 : vector<1x128xf32> to vector<8x128xf32>
    %23 = arith.addf %21, %22 : vector<8x128xf32>
    %24 = arith.addf %0, %23 : vector<8x128xf32>
    %cst_9 = arith.constant dense<0.000000e+00> : vector<8xf32>
    %25 = vector.multi_reduction <add>, %24, %cst_9 [1] : vector<8x128xf32> to vector<8xf32>
    %26 = vector.shape_cast %25 : vector<8xf32> to vector<8x1xf32>
    %cst_10 = arith.constant 3.125000e-02 : f32
    %27 = vector.broadcast %cst_10 : f32 to vector<8x1xf32>
    %28 = arith.mulf %26, %27 : vector<8x1xf32>
    %29 = arith.mulf %24, %24 : vector<8x128xf32>
    %cst_11 = arith.constant dense<0.000000e+00> : vector<8xf32>
    %30 = vector.multi_reduction <add>, %29, %cst_11 [1] : vector<8x128xf32> to vector<8xf32>
    %31 = vector.shape_cast %30 : vector<8xf32> to vector<8x1xf32>
    %cst_12 = arith.constant 3.125000e-02 : f32
    %32 = vector.broadcast %cst_12 : f32 to vector<8x1xf32>
    %33 = arith.mulf %31, %32 : vector<8x1xf32>
    %34 = arith.mulf %28, %28 : vector<8x1xf32>
    %35 = arith.subf %33, %34 : vector<8x1xf32>
    %cst_13 = arith.constant 0.000000e+00 : f32
    %36 = vector.broadcast %cst_13 : f32 to vector<8x1xf32>
    %37 = arith.maximumf %35, %36 : vector<8x1xf32>
    %38 = vector.broadcast %28 : vector<8x1xf32> to vector<8x128xf32>
    %39 = arith.subf %24, %38 : vector<8x128xf32>
    %cst_14 = arith.constant 9.99999974E-6 : f32
    %40 = vector.broadcast %cst_14 : f32 to vector<8x1xf32>
    %41 = arith.addf %37, %40 : vector<8x1xf32>
    %42 = math.rsqrt %41 : vector<8x1xf32>
    %43 = vector.broadcast %42 : vector<8x1xf32> to vector<8x128xf32>
    %44 = arith.mulf %39, %43 : vector<8x128xf32>
    %45 = vector.broadcast %14 : vector<1x128xf32> to vector<8x128xf32>
    %46 = arith.mulf %44, %45 : vector<8x128xf32>
    %47 = vector.broadcast %15 : vector<1x128xf32> to vector<8x128xf32>
    %48 = arith.addf %46, %47 : vector<8x128xf32>
    %49 = arith.truncf %48 : vector<8x128xf32> to vector<8x128xbf16>
    %cst_15 = arith.constant dense<0.000000e+00> : vector<8x128xf32>
    %50 = tpu.matmul %49, %6, %cst_15 {dimension_numbers = #tpu.dot_dimension_numbers<[1], [0], [0], [1], [0, 0, 1, 1], [], []>} : vector<8x128xbf16>, vector<128x128xbf16>, vector<8x128xf32> -> vector<8x128xf32>
    %51 = vector.broadcast %19 : vector<1x128xf32> to vector<8x128xf32>
    %52 = arith.addf %50, %51 : vector<8x128xf32>
    %cst_16 = arith.constant 0.000000e+00 : f32
    %53 = vector.broadcast %cst_16 : f32 to vector<8x128xf32>
    %54 = arith.maximumf %52, %53 : vector<8x128xf32>
    %55 = arith.truncf %54 : vector<8x128xf32> to vector<8x128xbf16>
    %cst_17 = arith.constant dense<0.000000e+00> : vector<8x128xf32>
    %56 = tpu.matmul %55, %9, %cst_17 {dimension_numbers = #tpu.dot_dimension_numbers<[1], [0], [0], [1], [0, 0, 1, 1], [], []>} : vector<8x128xbf16>, vector<128x128xbf16>, vector<8x128xf32> -> vector<8x128xf32>
    %57 = vector.broadcast %18 : vector<1x128xf32> to vector<8x128xf32>
    %58 = arith.addf %56, %57 : vector<8x128xf32>
    %59 = arith.addf %48, %58 : vector<8x128xf32>
    %cst_18 = arith.constant dense<0.000000e+00> : vector<8xf32>
    %60 = vector.multi_reduction <add>, %59, %cst_18 [1] : vector<8x128xf32> to vector<8xf32>
    %61 = vector.shape_cast %60 : vector<8xf32> to vector<8x1xf32>
    %cst_19 = arith.constant 3.125000e-02 : f32
    %62 = vector.broadcast %cst_19 : f32 to vector<8x1xf32>
    %63 = arith.mulf %61, %62 : vector<8x1xf32>
    %64 = arith.mulf %59, %59 : vector<8x128xf32>
    %cst_20 = arith.constant dense<0.000000e+00> : vector<8xf32>
    %65 = vector.multi_reduction <add>, %64, %cst_20 [1] : vector<8x128xf32> to vector<8xf32>
    %66 = vector.shape_cast %65 : vector<8xf32> to vector<8x1xf32>
    %cst_21 = arith.constant 3.125000e-02 : f32
    %67 = vector.broadcast %cst_21 : f32 to vector<8x1xf32>
    %68 = arith.mulf %66, %67 : vector<8x1xf32>
    %69 = arith.mulf %63, %63 : vector<8x1xf32>
    %70 = arith.subf %68, %69 : vector<8x1xf32>
    %cst_22 = arith.constant 0.000000e+00 : f32
    %71 = vector.broadcast %cst_22 : f32 to vector<8x1xf32>
    %72 = arith.maximumf %70, %71 : vector<8x1xf32>
    %73 = vector.broadcast %63 : vector<8x1xf32> to vector<8x128xf32>
    %74 = arith.subf %59, %73 : vector<8x128xf32>
    %cst_23 = arith.constant 9.99999974E-6 : f32
    %75 = vector.broadcast %cst_23 : f32 to vector<8x1xf32>
    %76 = arith.addf %72, %75 : vector<8x1xf32>
    %77 = math.rsqrt %76 : vector<8x1xf32>
    %78 = vector.broadcast %77 : vector<8x1xf32> to vector<8x128xf32>
    %79 = arith.mulf %74, %78 : vector<8x128xf32>
    %80 = vector.broadcast %16 : vector<1x128xf32> to vector<8x128xf32>
    %81 = arith.mulf %79, %80 : vector<8x128xf32>
    %82 = vector.broadcast %17 : vector<1x128xf32> to vector<8x128xf32>
    %83 = arith.addf %81, %82 : vector<8x128xf32>
    %c1_i32 = arith.constant 1 : i32
    %84 = arith.index_cast %c1_i32 : i32 to index
    %c0_24 = arith.constant 0 : index
    %c0_25 = arith.constant 0 : index
    %85 = vector.load %arg2[%84, %c0_24, %c0_25] : memref<2x128x128xbf16, #tpu.memory_space<vmem>>, vector<1x128x128xbf16>
    %86 = vector.shape_cast %85 : vector<1x128x128xbf16> to vector<128x128xbf16>
    %87 = arith.index_cast %c1_i32 : i32 to index
    %c0_26 = arith.constant 0 : index
    %c0_27 = arith.constant 0 : index
    %88 = vector.load %arg3[%87, %c0_26, %c0_27] : memref<2x128x128xbf16, #tpu.memory_space<vmem>>, vector<1x128x128xbf16>
    %89 = vector.shape_cast %88 : vector<1x128x128xbf16> to vector<128x128xbf16>
    %90 = arith.index_cast %c1_i32 : i32 to index
    %c0_28 = arith.constant 0 : index
    %c0_29 = arith.constant 0 : index
    %91 = vector.load %arg4[%90, %c0_28, %c0_29] : memref<2x128x128xbf16, #tpu.memory_space<vmem>>, vector<1x128x128xbf16>
    %92 = vector.shape_cast %91 : vector<1x128x128xbf16> to vector<128x128xbf16>
    %93 = arith.index_cast %c1_i32 : i32 to index
    %c0_30 = arith.constant 0 : index
    %c0_31 = arith.constant 0 : index
    %94 = vector.load %arg5[%93, %c0_30, %c0_31] : memref<2x8x128xf32, #tpu.memory_space<vmem>>, vector<1x8x128xf32>
    %95 = vector.shape_cast %94 : vector<1x8x128xf32> to vector<8x128xf32>
    %96 = vector.extract_strided_slice %95 {offsets = [0, 0], sizes = [1, 128], strides = [1, 1]} : vector<8x128xf32> to vector<1x128xf32>
    %97 = vector.extract_strided_slice %95 {offsets = [1, 0], sizes = [1, 128], strides = [1, 1]} : vector<8x128xf32> to vector<1x128xf32>
    %98 = vector.extract_strided_slice %95 {offsets = [2, 0], sizes = [1, 128], strides = [1, 1]} : vector<8x128xf32> to vector<1x128xf32>
    %99 = vector.extract_strided_slice %95 {offsets = [3, 0], sizes = [1, 128], strides = [1, 1]} : vector<8x128xf32> to vector<1x128xf32>
    %100 = vector.extract_strided_slice %95 {offsets = [4, 0], sizes = [1, 128], strides = [1, 1]} : vector<8x128xf32> to vector<1x128xf32>
    %101 = vector.extract_strided_slice %95 {offsets = [5, 0], sizes = [1, 128], strides = [1, 1]} : vector<8x128xf32> to vector<1x128xf32>
    %102 = vector.extract_strided_slice %95 {offsets = [6, 0], sizes = [1, 128], strides = [1, 1]} : vector<8x128xf32> to vector<1x128xf32>
    %103 = arith.truncf %83 : vector<8x128xf32> to vector<8x128xbf16>
    %cst_32 = arith.constant dense<0.000000e+00> : vector<8x128xf32>
    %104 = tpu.matmul %103, %86, %cst_32 {dimension_numbers = #tpu.dot_dimension_numbers<[1], [0], [0], [1], [0, 0, 1, 1], [], []>} : vector<8x128xbf16>, vector<128x128xbf16>, vector<8x128xf32> -> vector<8x128xf32>
    %105 = vector.broadcast %96 : vector<1x128xf32> to vector<8x128xf32>
    %106 = arith.addf %104, %105 : vector<8x128xf32>
    %107 = arith.addf %83, %106 : vector<8x128xf32>
    %cst_33 = arith.constant dense<0.000000e+00> : vector<8xf32>
    %108 = vector.multi_reduction <add>, %107, %cst_33 [1] : vector<8x128xf32> to vector<8xf32>
    %109 = vector.shape_cast %108 : vector<8xf32> to vector<8x1xf32>
    %cst_34 = arith.constant 3.125000e-02 : f32
    %110 = vector.broadcast %cst_34 : f32 to vector<8x1xf32>
    %111 = arith.mulf %109, %110 : vector<8x1xf32>
    %112 = arith.mulf %107, %107 : vector<8x128xf32>
    %cst_35 = arith.constant dense<0.000000e+00> : vector<8xf32>
    %113 = vector.multi_reduction <add>, %112, %cst_35 [1] : vector<8x128xf32> to vector<8xf32>
    %114 = vector.shape_cast %113 : vector<8xf32> to vector<8x1xf32>
    %cst_36 = arith.constant 3.125000e-02 : f32
    %115 = vector.broadcast %cst_36 : f32 to vector<8x1xf32>
    %116 = arith.mulf %114, %115 : vector<8x1xf32>
    %117 = arith.mulf %111, %111 : vector<8x1xf32>
    %118 = arith.subf %116, %117 : vector<8x1xf32>
    %cst_37 = arith.constant 0.000000e+00 : f32
    %119 = vector.broadcast %cst_37 : f32 to vector<8x1xf32>
    %120 = arith.maximumf %118, %119 : vector<8x1xf32>
    %121 = vector.broadcast %111 : vector<8x1xf32> to vector<8x128xf32>
    %122 = arith.subf %107, %121 : vector<8x128xf32>
    %cst_38 = arith.constant 9.99999974E-6 : f32
    %123 = vector.broadcast %cst_38 : f32 to vector<8x1xf32>
    %124 = arith.addf %120, %123 : vector<8x1xf32>
    %125 = math.rsqrt %124 : vector<8x1xf32>
    %126 = vector.broadcast %125 : vector<8x1xf32> to vector<8x128xf32>
    %127 = arith.mulf %122, %126 : vector<8x128xf32>
    %128 = vector.broadcast %97 : vector<1x128xf32> to vector<8x128xf32>
    %129 = arith.mulf %127, %128 : vector<8x128xf32>
    %130 = vector.broadcast %98 : vector<1x128xf32> to vector<8x128xf32>
    %131 = arith.addf %129, %130 : vector<8x128xf32>
    %132 = arith.truncf %131 : vector<8x128xf32> to vector<8x128xbf16>
    %cst_39 = arith.constant dense<0.000000e+00> : vector<8x128xf32>
    %133 = tpu.matmul %132, %89, %cst_39 {dimension_numbers = #tpu.dot_dimension_numbers<[1], [0], [0], [1], [0, 0, 1, 1], [], []>} : vector<8x128xbf16>, vector<128x128xbf16>, vector<8x128xf32> -> vector<8x128xf32>
    %134 = vector.broadcast %102 : vector<1x128xf32> to vector<8x128xf32>
    %135 = arith.addf %133, %134 : vector<8x128xf32>
    %cst_40 = arith.constant 0.000000e+00 : f32
    %136 = vector.broadcast %cst_40 : f32 to vector<8x128xf32>
    %137 = arith.maximumf %135, %136 : vector<8x128xf32>
    %138 = arith.truncf %137 : vector<8x128xf32> to vector<8x128xbf16>
    %cst_41 = arith.constant dense<0.000000e+00> : vector<8x128xf32>
    %139 = tpu.matmul %138, %92, %cst_41 {dimension_numbers = #tpu.dot_dimension_numbers<[1], [0], [0], [1], [0, 0, 1, 1], [], []>} : vector<8x128xbf16>, vector<128x128xbf16>, vector<8x128xf32> -> vector<8x128xf32>
    %140 = vector.broadcast %101 : vector<1x128xf32> to vector<8x128xf32>
    %141 = arith.addf %139, %140 : vector<8x128xf32>
    %142 = arith.addf %131, %141 : vector<8x128xf32>
    %cst_42 = arith.constant dense<0.000000e+00> : vector<8xf32>
    %143 = vector.multi_reduction <add>, %142, %cst_42 [1] : vector<8x128xf32> to vector<8xf32>
    %144 = vector.shape_cast %143 : vector<8xf32> to vector<8x1xf32>
    %cst_43 = arith.constant 3.125000e-02 : f32
    %145 = vector.broadcast %cst_43 : f32 to vector<8x1xf32>
    %146 = arith.mulf %144, %145 : vector<8x1xf32>
    %147 = arith.mulf %142, %142 : vector<8x128xf32>
    %cst_44 = arith.constant dense<0.000000e+00> : vector<8xf32>
    %148 = vector.multi_reduction <add>, %147, %cst_44 [1] : vector<8x128xf32> to vector<8xf32>
    %149 = vector.shape_cast %148 : vector<8xf32> to vector<8x1xf32>
    %cst_45 = arith.constant 3.125000e-02 : f32
    %150 = vector.broadcast %cst_45 : f32 to vector<8x1xf32>
    %151 = arith.mulf %149, %150 : vector<8x1xf32>
    %152 = arith.mulf %146, %146 : vector<8x1xf32>
    %153 = arith.subf %151, %152 : vector<8x1xf32>
    %cst_46 = arith.constant 0.000000e+00 : f32
    %154 = vector.broadcast %cst_46 : f32 to vector<8x1xf32>
    %155 = arith.maximumf %153, %154 : vector<8x1xf32>
    %156 = vector.broadcast %146 : vector<8x1xf32> to vector<8x128xf32>
    %157 = arith.subf %142, %156 : vector<8x128xf32>
    %cst_47 = arith.constant 9.99999974E-6 : f32
    %158 = vector.broadcast %cst_47 : f32 to vector<8x1xf32>
    %159 = arith.addf %155, %158 : vector<8x1xf32>
    %160 = math.rsqrt %159 : vector<8x1xf32>
    %161 = vector.broadcast %160 : vector<8x1xf32> to vector<8x128xf32>
    %162 = arith.mulf %157, %161 : vector<8x128xf32>
    %163 = vector.broadcast %99 : vector<1x128xf32> to vector<8x128xf32>
    %164 = arith.mulf %162, %163 : vector<8x128xf32>
    %165 = vector.broadcast %100 : vector<1x128xf32> to vector<8x128xf32>
    %166 = arith.addf %164, %165 : vector<8x128xf32>
    %c2_i32 = arith.constant 2 : i32
    %167 = arith.truncf %166 : vector<8x128xf32> to vector<8x128xbf16>
    %c0_48 = arith.constant 0 : index
    %c0_49 = arith.constant 0 : index
    %168 = vector.load %arg6[%c0_48, %c0_49] : memref<128x128xbf16, #tpu.memory_space<vmem>>, vector<128x128xbf16>
    %cst_50 = arith.constant dense<0.000000e+00> : vector<8x128xf32>
    %169 = tpu.matmul %167, %168, %cst_50 {dimension_numbers = #tpu.dot_dimension_numbers<[1], [0], [0], [1], [0, 0, 1, 1], [], []>} : vector<8x128xbf16>, vector<128x128xbf16>, vector<8x128xf32> -> vector<8x128xf32>
    %c0_51 = arith.constant 0 : index
    %c0_52 = arith.constant 0 : index
    %170 = vector.load %arg7[%c0_51, %c0_52] : memref<1x128xf32, #tpu.memory_space<vmem>>, vector<1x128xf32>
    %171 = vector.broadcast %170 : vector<1x128xf32> to vector<8x128xf32>
    %172 = arith.addf %169, %171 : vector<8x128xf32>
    %c0_53 = arith.constant 0 : index
    %c0_54 = arith.constant 0 : index
    %173 = vector.load %arg8[%c0_53, %c0_54] : memref<8x128xf32, #tpu.memory_space<vmem>>, vector<8x128xf32>
    tpu.vector_store %arg8[%c0_53, %c0_54], %172 {strides = array<i32>} : memref<8x128xf32, #tpu.memory_space<vmem>>, vector<8x128xf32>,
    return
  }
  func.func @transform_0(%arg0: i32) -> (i32, i32) {
    %c0_i32 = arith.constant 0 : i32
    %c0_i32_0 = arith.constant 0 : i32
    return %arg0, %c0_i32 : i32, i32
  }
  func.func @transform_1(%arg0: i32) -> (i32, i32, i32) {
    %c0_i32 = arith.constant 0 : i32
    %c0_i32_0 = arith.constant 0 : i32
    %c0_i32_1 = arith.constant 0 : i32
    %c0_i32_2 = arith.constant 0 : i32
    return %c0_i32, %c0_i32_0, %c0_i32_1 : i32, i32, i32
  }
  func.func @transform_2(%arg0: i32) -> (i32, i32, i32) {
    %c0_i32 = arith.constant 0 : i32
    %c0_i32_0 = arith.constant 0 : i32
    %c0_i32_1 = arith.constant 0 : i32
    %c0_i32_2 = arith.constant 0 : i32
    return %c0_i32, %c0_i32_0, %c0_i32_1 : i32, i32, i32
  }
  func.func @transform_3(%arg0: i32) -> (i32, i32, i32) {
    %c0_i32 = arith.constant 0 : i32
    %c0_i32_0 = arith.constant 0 : i32
    %c0_i32_1 = arith.constant 0 : i32
    %c0_i32_2 = arith.constant 0 : i32
    return %c0_i32, %c0_i32_0, %c0_i32_1 : i32, i32, i32
  }
  func.func @transform_4(%arg0: i32) -> (i32, i32, i32) {
    %c0_i32 = arith.constant 0 : i32
    %c0_i32_0 = arith.constant 0 : i32
    %c0_i32_1 = arith.constant 0 : i32
    %c0_i32_2 = arith.constant 0 : i32
    return %c0_i32, %c0_i32_0, %c0_i32_1 : i32, i32, i32
  }
  func.func @transform_5(%arg0: i32) -> (i32, i32) {
    %c0_i32 = arith.constant 0 : i32
    %c0_i32_0 = arith.constant 0 : i32
    %c0_i32_1 = arith.constant 0 : i32
    return %c0_i32, %c0_i32_0 : i32, i32
  }
  func.func @transform_6(%arg0: i32) -> (i32, i32) {
    %c0_i32 = arith.constant 0 : i32
    %c0_i32_0 = arith.constant 0 : i32
    %c0_i32_1 = arith.constant 0 : i32
    return %c0_i32, %c0_i32_0 : i32, i32
  }
  func.func @transform_7(%arg0: i32) -> (i32, i32) {
    %c0_i32 = arith.constant 0 : i32
    %c0_i32_0 = arith.constant 0 : i32
    return %arg0, %c0_i32 : i32, i32
  }
}

</mosaic_0001>

<bundles_post_ra>
// kernel: tpu_custom_call.1
= control target key start
LH: loop header
LB: loop body
LE: loop exit
PB: predicated region body
PF: predicated region fallthrough
CT: control target
= control target key end

     0   :  { %12 = vsyncpa [#allocation3], 0  ;;  %s1780_s0 = inlined_call_operand.hbm [shape: f32[8,128], index: 0, kind: input, shape index: {}]   ;;  %s1781_s1 = inlined_call_operand.hbm [shape: bf16[2,128,128], index: 1, kind: input, shape index: {}]   ;;  %s1782_s2 = inlined_call_operand.hbm [shape: bf16[2,128,128], index: 2, kind: input, shape index: {}]   ;;  %s1783_s3 = inlined_call_operand.hbm [shape: bf16[2,128,128], index: 3, kind: input, shape index: {}]   ;;  %s1784_s4 = inlined_call_operand.hbm [shape: f32[2,8,128], index: 4, kind: input, shape index: {}]   ;;  %s1785_s5 = inlined_call_operand.hbm [shape: bf16[128,128], index: 5, kind: input, shape index: {}]   ;;  %s1786_s6 = inlined_call_operand.vmem [shape: f32[1,128], index: 6, kind: input, shape index: {}]   ;;  %s1787_s7 = inlined_call_operand.hbm [shape: f32[8,128], index: 7, kind: output, shape index: {}]  }
   0x1   :  { %13 = vsyncpa [#allocation6], 0 }
   0x2   :  { %14 = vsyncpa [#allocation9], 0 }
   0x3   :  { %15 = vsyncpa [#allocation12], 0 }
   0x4   :  { %16 = vsyncpa [#allocation4], 0  ;;  %s1503_s24 = smov [#allocation5]   ;;  %s1339_s28 = scalar_lea.hbm %s1781_s1, 2048 }
   0x5   :  { %s32_s25 = sshll.u32 %s1503_s24, 4  ;;  %p1340_p0 = scmp.ne.s32.totalorder %s1781_s1, %s1339_s28  ;;  %s33_s25 = int_to_ptr.vmem [resolvable:$true] %s32_s25 }
   0x6   :  { %p1343_p1 = scmp.lt.u32.totalorder %s1339_s28, %s1781_s1 }
   0x8   :  { %p1345_p2 = pnand %p1343_p1, %p1340_p0 }
   0xa   :  { %1348 = shalt.err (!%p1345_p2)
}
   0xb   :  { %s1349_s10 = scalar_lea.vmem %s33_s25, 2048  ;;  %p1354_p4 = scmp.lt.s32.totalorder %s33_s25, %s33_s25 }
   0xc   :  { %p1350_p3 = scmp.ne.s32.totalorder %s33_s25, %s1349_s10  ;;  %p1355_p5 = scmp.lt.s32.totalorder %s1349_s10, %s1349_s10 }
   0xe   :  { %p1356_p6 = por %p1355_p5, %p1354_p4 }
  0x10   :  { %p1357_p7 = pnand %p1356_p6, %p1350_p3 }
  0x12   :  { %1360 = shalt.err (!%p1357_p7)
}
  0x13   :  { %s1504_s11 = smov 64   ;;  %s1505_s12 = smov 4  }
  0x14   :  { %38 = dma.hbm_to_vmem [thread:$0]  %s1781_s1, 2048, %s33_s25, [#allocation6], %s1504_s11, %s1504_s11, %s1505_s12  }
  0x15   :  { %s1506_s15 = smov [#allocation8]   ;;  %s1507_s17 = smov [#allocation2]  }
  0x16   :  { %s56_s16 = sshll.u32 %s1506_s15, 4  ;;  %s23_s18 = sshll.u32 %s1507_s17, 4  ;;  %s57_s16 = int_to_ptr.vmem [resolvable:$true] %s56_s16  ;;  %s24_s18 = int_to_ptr.vmem [resolvable:$true] %s23_s18 }
  0x17   :  { %s1361_s21 = scalar_lea.hbm %s1783_s3, 2048 }
  0x18   :  { %p1362_p8 = scmp.ne.s32.totalorder %s1783_s3, %s1361_s21  ;;  %p1365_p9 = scmp.lt.u32.totalorder %s1361_s21, %s1783_s3 }
  0x1a   :  { %p1367_p10 = pnand %p1365_p9, %p1362_p8 }
  0x1c   :  { %1370 = shalt.err (!%p1367_p10)
}
  0x1d   :  { %s1371_s1 = scalar_lea.vmem %s57_s16, 2048  ;;  %p1376_p12 = scmp.lt.s32.totalorder %s57_s16, %s57_s16 }
  0x1e   :  { %p1372_p11 = scmp.ne.s32.totalorder %s57_s16, %s1371_s1  ;;  %p1377_p13 = scmp.lt.s32.totalorder %s1371_s1, %s1371_s1 }
  0x20   :  { %p1378_p0 = por %p1377_p13, %p1376_p12 }
  0x22   :  { %p1379_p1 = pnand %p1378_p0, %p1372_p11 }
  0x24   :  { %1382 = shalt.err (!%p1379_p1)
}
  0x25   :  { %62 = dma.hbm_to_vmem [thread:$0]  %s1783_s3, 2048, %s57_s16, [#allocation9], %s1504_s11, %s1504_s11, %s1505_s12  }
  0x26   :  { %s1383_s30 = scalar_lea.hbm %s1780_s0, 128 }
  0x27   :  { %p1384_p2 = scmp.ne.s32.totalorder %s1780_s0, %s1383_s30  ;;  %p1387_p3 = scmp.lt.u32.totalorder %s1383_s30, %s1780_s0 }
  0x29   :  { %p1389_p4 = pnand %p1387_p3, %p1384_p2 }
  0x2b   :  { %1392 = shalt.err (!%p1389_p4)
}
  0x2c   :  { %s1393_s14 = scalar_lea.vmem %s24_s18, 128  ;;  %p1398_p6 = scmp.lt.s32.totalorder %s24_s18, %s24_s18 }
  0x2d   :  { %p1394_p5 = scmp.ne.s32.totalorder %s24_s18, %s1393_s14  ;;  %p1399_p7 = scmp.lt.s32.totalorder %s1393_s14, %s1393_s14 }
  0x2f   :  { %p1400_p8 = por %p1399_p7, %p1398_p6 }
  0x31   :  { %p1401_p9 = pnand %p1400_p8, %p1394_p5 }
  0x33   :  { %1404 = shalt.err (!%p1401_p9)
}
  0x34   :  { %26 = dma.hbm_to_vmem [thread:$0]  %s1780_s0, 128, %s24_s18, [#allocation3]  }
  0x35   :  { %s1508_s16 = smov [#allocation7]   ;;  %s1509_s19 = smov [#allocation10]  }
  0x36   :  { %s44_s17 = sshll.u32 %s1508_s16, 4  ;;  %s68_s20 = sshll.u32 %s1509_s19, 4  ;;  %s45_s17 = int_to_ptr.vmem [resolvable:$true] %s44_s17  ;;  %s69_s20 = int_to_ptr.vmem [resolvable:$true] %s68_s20 }
  0x37   :  { %s1405_s23 = scalar_lea.hbm %s1782_s2, 2048 }
  0x38   :  { %p1406_p10 = scmp.ne.s32.totalorder %s1782_s2, %s1405_s23  ;;  %p1409_p11 = scmp.lt.u32.totalorder %s1405_s23, %s1782_s2 }
  0x3a   :  { %p1411_p12 = pnand %p1409_p11, %p1406_p10 }
  0x3c   :  { %1414 = shalt.err (!%p1411_p12)
}
  0x3d   :  { %s1415_s0 = scalar_lea.vmem %s45_s17, 2048  ;;  %p1420_p0 = scmp.lt.s32.totalorder %s45_s17, %s45_s17 }
  0x3e   :  { %p1416_p13 = scmp.ne.s32.totalorder %s45_s17, %s1415_s0  ;;  %p1421_p1 = scmp.lt.s32.totalorder %s1415_s0, %s1415_s0 }
  0x40   :  { %p1422_p2 = por %p1421_p1, %p1420_p0 }
  0x42   :  { %p1423_p3 = pnand %p1422_p2, %p1416_p13 }
  0x44   :  { %1426 = shalt.err (!%p1423_p3)
}
  0x45   :  { %50 = dma.hbm_to_vmem [thread:$0]  %s1782_s2, 2048, %s45_s17, [#allocation6], %s1504_s11, %s1504_s11, %s1505_s12  }
  0x46   :  { %s1427_s30 = scalar_lea.hbm %s1784_s4, 256 }
  0x47   :  { %p1428_p4 = scmp.ne.s32.totalorder %s1784_s4, %s1427_s30  ;;  %p1431_p5 = scmp.lt.u32.totalorder %s1427_s30, %s1784_s4 }
  0x49   :  { %p1433_p6 = pnand %p1431_p5, %p1428_p4 }
  0x4b   :  { %1436 = shalt.err (!%p1433_p6)
}
  0x4c   :  { %s1437_s14 = scalar_lea.vmem %s69_s20, 256  ;;  %p1442_p8 = scmp.lt.s32.totalorder %s69_s20, %s69_s20 }
  0x4d   :  { %p1438_p7 = scmp.ne.s32.totalorder %s69_s20, %s1437_s14  ;;  %p1443_p9 = scmp.lt.s32.totalorder %s1437_s14, %s1437_s14 }
  0x4f   :  { %p1444_p10 = por %p1443_p9, %p1442_p8 }
  0x51   :  { %p1445_p11 = pnand %p1444_p10, %p1438_p7 }
  0x53   :  { %1448 = shalt.err (!%p1445_p11)
}
  0x54   :  { %s1510_s2 = smov 128   ;;  %s1511_s3 = smov 8  }
  0x55   :  { %74 = dma.hbm_to_vmem [thread:$0]  %s1784_s4, 256, %s69_s20, [#allocation9], %s1510_s2, %s1510_s2, %s1511_s3  }
  0x56   :  { %s1512_s17 = smov [#allocation11]   ;;  %s1449_s23 = scalar_lea.hbm %s1785_s5, 1024 }
  0x57   :  { %s80_s19 = sshll.u32 %s1512_s17, 4  ;;  %p1450_p12 = scmp.ne.s32.totalorder %s1785_s5, %s1449_s23  ;;  %s81_s19 = int_to_ptr.vmem [resolvable:$true] %s80_s19 }
  0x58   :  { %p1453_p13 = scmp.lt.u32.totalorder %s1449_s23, %s1785_s5 }
  0x5a   :  { %p1455_p0 = pnand %p1453_p13, %p1450_p12 }
  0x5c   :  { %1458 = shalt.err (!%p1455_p0)
}
  0x5d   :  { %s1459_s0 = scalar_lea.vmem %s81_s19, 1024  ;;  %p1464_p2 = scmp.lt.s32.totalorder %s81_s19, %s81_s19 }
  0x5e   :  { %p1460_p1 = scmp.ne.s32.totalorder %s81_s19, %s1459_s0  ;;  %p1465_p3 = scmp.lt.s32.totalorder %s1459_s0, %s1459_s0 }
  0x60   :  { %p1466_p4 = por %p1465_p3, %p1464_p2 }
  0x62   :  { %p1467_p5 = pnand %p1466_p4, %p1460_p1 }
  0x64   :  { %1470 = shalt.err (!%p1467_p5)
}
  0x65   :  { %86 = dma.hbm_to_vmem [thread:$0]  %s1785_s5, 1024, %s81_s19, [#allocation12], %s1504_s11, %s1504_s11, %s1505_s12  }
  0x66   :  { %1493 = dma.done.wait [#allocation3], 128  }
  0x67   :  { %1494 = vsyncadd [#allocation3], 4294967168 }
  0x68   :  { %1495 = dma.done.wait [#allocation6], 4096  }
  0x69   :  { %1496 = vsyncadd [#allocation6], 4294963200 }
  0x6a   :  { %1497 = dma.done.wait [#allocation9], 2304  }
  0x6b   :  { %1498 = vsyncadd [#allocation9], 4294964992 }
  0x6c   :  { %1499 = dma.done.wait [#allocation12], 1024  }
  0x6d   :  { %1500 = vsyncadd [#allocation12], 4294966272  ;;  %v1513_v0 = vmov 0.0   ;;  %vm1514_vm0 = vmmov 0   ;;  %v1275_v1 = vld [vmem:[#allocation5] sm:$0xff]   ;;  %v1276_v2 = vld [vmem:[#allocation5 + $0x8] sm:$0xff]   ;;  %v159_v11 = vlaneseq }
  0x6e   :  { %1122 = vmatprep.subr.bf16.mxu0 %v1513_v0  ;;  %1138 = vmatprep.mubr.msk.bf16.mxu0 %vm1514_vm0, %v1513_v0  ;;  %v1277_v3 = vld [vmem:[#allocation5 + $0x10] sm:$0xff]   ;;  %v1278_v4 = vld [vmem:[#allocation5 + $0x18] sm:$0xff]   ;;  %v1279_v5 = vld [vmem:[#allocation5 + $0x20] sm:$0xff]   ;;  %s1515_s12 = smov [#allocation13]  }
  0x6f   :  { %1142 = vmatprep.subr.bf16.mxu1 %v1513_v0  ;;  %1158 = vmatprep.mubr.msk.bf16.mxu1 %vm1514_vm0, %v1513_v0  ;;  %v1280_v6 = vld [vmem:[#allocation5 + $0x28] sm:$0xff]   ;;  %v1281_v7 = vld [vmem:[#allocation5 + $0x30] sm:$0xff]   ;;  %v1282_v8 = vld [vmem:[#allocation5 + $0x38] sm:$0xff]   ;;  %v1656_v12 = vshrl.u32 %v159_v11, 7  ;;  %s990_s18 = sshll.u32 %s1515_s12, 4  ;;  %s991_s18 = int_to_ptr.vmem [resolvable:$true] %s990_s18 }
  0x70   :  { %1123 = vmatpush3.bf16.msra.mxu0 %v1275_v1  ;;  %v108_v9 = vld [vmem:[#allocation2] sm:$0xff]  ;;  %v1659_v14 = vld [vmem:[#allocation10] sm:$0xff]  ;;  %v1284_v24 = vld [vmem:[#allocation7 + $0x8] sm:$0xff]   ;;  %s1471_s27 = scalar_lea.vmem %s991_s18, 128  ;;  %p1476_p7 = scmp.lt.s32.totalorder %s991_s18, %s991_s18 }
  0x71   :  { %1124 = vmatprep.subr.bf16.mxu0 %v1513_v0  ;;  %v158_v10 = vpack.c.bf16 %v108_v9, %v108_v9  ;;  %v161_v13 = vsub.s32 0, %v1656_v12  ;;  %v1283_v23 = vld [vmem:[#allocation7] sm:$0xff]   ;;  %v1285_v25 = vld [vmem:[#allocation7 + $0x10] sm:$0xff]   ;;  %v1286_v26 = vld [vmem:[#allocation7 + $0x18] sm:$0xff]   ;;  %v268_v45 = vsub.s32 1, %v1656_v12  ;;  %v273_v46 = vsub.s32 2, %v1656_v12  ;;  %p1472_p6 = scmp.ne.s32.totalorder %s991_s18, %s1471_s27  ;;  %p1477_p8 = scmp.lt.s32.totalorder %s1471_s27, %s1471_s27 }
  0x72   :  { %1143 = vmatpush3.bf16.msra.mxu1 %v1283_v23  ;;  %v1287_v27 = vld [vmem:[#allocation7 + $0x20] sm:$0xff]   ;;  %v1288_v28 = vld [vmem:[#allocation7 + $0x28] sm:$0xff]   ;;  %v1289_v29 = vld [vmem:[#allocation7 + $0x30] sm:$0xff]   ;;  %v279_v57 = vsub.s32 6, %v1656_v12 }
  0x73   :  { %v162_v15 = vrot.slane %v1659_v14, %v161_v13  ;;  %1144 = vmatprep.subr.bf16.mxu1 %v1513_v0  ;;  %v1290_v30 = vld [vmem:[#allocation7 + $0x38] sm:$0xff]   ;;  %v1291_v31 = vld [vmem:[#allocation8] sm:$0xff]   ;;  %v1292_v32 = vld [vmem:[#allocation8 + $0x8] sm:$0xff]   ;;  %v269_v48 = vrot.slane %v1659_v14, %v268_v45  ;;  %v274_v51 = vrot.slane %v1659_v14, %v273_v46  ;;  %p1478_p9 = por %p1477_p8, %p1476_p7 }
  0x74   :  { %1125 = vmatpush3.bf16.msra.mxu0 %v1276_v2  ;;  %v1293_v33 = vld [vmem:[#allocation8 + $0x10] sm:$0xff]   ;;  %v1294_v34 = vld [vmem:[#allocation8 + $0x18] sm:$0xff]   ;;  %v1295_v35 = vld [vmem:[#allocation8 + $0x20] sm:$0xff]   ;;  %v280_v58 = vrot.slane %v1659_v14, %v279_v57 }
  0x75   :  { %1126 = vmatprep.subr.bf16.mxu0 %v1513_v0  ;;  %v1296_v36 = vld [vmem:[#allocation8 + $0x28] sm:$0xff]   ;;  %v1297_v55 = vld [vmem:[#allocation8 + $0x30] sm:$0xff]   ;;  %v1298_v56 = vld [vmem:[#allocation8 + $0x38] sm:$0xff]   ;;  %p1479_p10 = pnand %p1478_p9, %p1472_p6 }
  0x76   :  { %1145 = vmatpush3.bf16.msra.mxu1 %v1284_v24 }
  0x77   :  { %1146 = vmatprep.subr.bf16.mxu1 %v1513_v0 }
  0x78   :  { %1127 = vmatpush3.bf16.msra.mxu0 %v1277_v3  ;;  %v373_v3 = vsub.s32 5, %v1656_v12 }
  0x79   :  { %1128 = vmatprep.subr.bf16.mxu0 %v1513_v0 }
  0x7a   :  { %1147 = vmatpush3.bf16.msra.mxu1 %v1285_v25 }
  0x7b   :  { %1148 = vmatprep.subr.bf16.mxu1 %v1513_v0 }
  0x7c   :  { %1129 = vmatpush3.bf16.msra.mxu0 %v1278_v4  ;;  %v374_v4 = vrot.slane %v1659_v14, %v373_v3 }
  0x7d   :  { %1130 = vmatprep.subr.bf16.mxu0 %v1513_v0 }
  0x7e   :  { %1149 = vmatpush3.bf16.msra.mxu1 %v1286_v26 }
  0x7f   :  { %1150 = vmatprep.subr.bf16.mxu1 %v1513_v0 }
  0x80   :  { %1131 = vmatpush3.bf16.msra.mxu0 %v1279_v5 }
  0x81   :  { %1132 = vmatprep.subr.bf16.mxu0 %v1513_v0 }
  0x82   :  { %1151 = vmatpush3.bf16.msra.mxu1 %v1287_v27 }
  0x83   :  { %1152 = vmatprep.subr.bf16.mxu1 %v1513_v0 }
  0x84   :  { %1133 = vmatpush3.bf16.msra.mxu0 %v1280_v6 }
  0x85   :  { %1134 = vmatprep.subr.bf16.mxu0 %v1513_v0 }
  0x86   :  { %1153 = vmatpush3.bf16.msra.mxu1 %v1288_v28 }
  0x87   :  { %1154 = vmatprep.subr.bf16.mxu1 %v1513_v0 }
  0x88   :  { %1135 = vmatpush3.bf16.msra.mxu0 %v1281_v7 }
  0x89   :  { %1136 = vmatprep.subr.bf16.mxu0 %v1513_v0 }
  0x8a   :  { %1155 = vmatpush3.bf16.msra.mxu1 %v1289_v29 }
  0x8b   :  { %1156 = vmatprep.subr.bf16.mxu1 %v1513_v0 }
  0x8c   :  { %1137 = vmatpush3.bf16.msra.mxu0 %v1282_v8 }
  0x8d   :  { %1162 = vmatprep.subr.bf16.mxu0 %v1513_v0 }
  0x8e   :  { %1157 = vmatpush3.bf16.msra.mxu1 %v1290_v30 }
  0x8f   :  { %1139 = vmatmul.mubr.bf16.vlgmr.msra.gmra.mrb[0].mxu0 %v158_v10  ;;  %1182 = vmatprep.subr.bf16.mxu1 %v1513_v0 }
  0x90   :  { %1178 = vmatprep.mubr.msk.bf16.mxu0 %vm1514_vm0, %v1513_v0  ;;  %1163 = vmatpush3.bf16.msra.mxu0 %v1291_v31  ;;  %v480_v31 = vsub.s32 3, %v1656_v12 }
  0x91   :  { %1164 = vmatprep.subr.bf16.mxu0 %v1513_v0 }
  0x94   :  { %1165 = vmatpush3.bf16.msra.mxu0 %v1292_v32  ;;  %v485_v32 = vsub.s32 4, %v1656_v12 }
  0x95   :  { %1166 = vmatprep.subr.bf16.mxu0 %v1513_v0 }
  0x98   :  { %1167 = vmatpush3.bf16.msra.mxu0 %v1293_v33 }
  0x99   :  { %1168 = vmatprep.subr.bf16.mxu0 %v1513_v0 }
  0x9c   :  { %1169 = vmatpush3.bf16.msra.mxu0 %v1294_v34  ;;  %v481_v34 = vrot.slane %v1659_v14, %v480_v31 }
  0x9d   :  { %1170 = vmatprep.subr.bf16.mxu0 %v1513_v0 }
  0xa0   :  { %1171 = vmatpush3.bf16.msra.mxu0 %v1295_v35 }
  0xa1   :  { %1172 = vmatprep.subr.bf16.mxu0 %v1513_v0 }
  0xa4   :  { %1173 = vmatpush3.bf16.msra.mxu0 %v1296_v36 }
  0xa5   :  { %1174 = vmatprep.subr.bf16.mxu0 %v1513_v0 }
  0xa8   :  { %1175 = vmatpush3.bf16.msra.mxu0 %v1297_v55  ;;  %v1312_v55 = vld [vmem:[#allocation7 + $0x68] sm:$0xff]  }
  0xa9   :  { %1176 = vmatprep.subr.bf16.mxu0 %v1513_v0 }
  0xac   :  { %1177 = vmatpush3.bf16.msra.mxu0 %v1298_v56  ;;  %v1313_v56 = vld [vmem:[#allocation7 + $0x70] sm:$0xff]  }
  0xad   :  { %1202 = vmatprep.subr.bf16.mxu0 %v1513_v0 }
 0x162   :  { %v245_v16 = vpop.f32.mrb[0].mxu0 }
 0x163   :  { %v246_v17 = vadd.f32 %v245_v16, %v162_v15  ;;  %v1140_v18 = vpop.f32.mrb[1].mxu0  ;;  %v1299_v15 = vld [vmem:[#allocation5 + $0x40] sm:$0xff]   ;;  %v1300_v16 = vld [vmem:[#allocation5 + $0x48] sm:$0xff]  }
 0x164   :  { %v248_v19 = vpop.f32.mrb[2].mxu0  ;;  %v1302_v18 = vld [vmem:[#allocation5 + $0x58] sm:$0xff]  }
 0x165   :  { %v251_v20 = vadd.f32 %v246_v17, %v108_v9  ;;  %v1141_v21 = vpop.f32.mrb[3].mxu0  ;;  %v1301_v17 = vld [vmem:[#allocation5 + $0x50] sm:$0xff]   ;;  %v1303_v19 = vld [vmem:[#allocation5 + $0x60] sm:$0xff]  }
 0x166   :  { %v1305_v21 = vld [vmem:[#allocation5 + $0x70] sm:$0xff]  }
 0x167   :  { %252 = vadd.xlane.f32.xlu0 %v251_v20  ;;  %v255_v22 = vmul.f32 %v251_v20, %v251_v20 }
 0x16b   :  { %256 = vadd.xlane.f32.xlu0 %v255_v22  ;;  %v1306_v22 = vld [vmem:[#allocation5 + $0x78] sm:$0xff]  }
 0x1f4   :  { %v253_v37 = vpop.xlane.xlu0 %252 }
 0x1f5   :  { %v254_v38 = vmul.f32 0.03125, %v253_v37  ;;  %v486_v37 = vrot.slane %v1659_v14, %v485_v32 }
 0x1f7   :  { %v259_v40 = vmul.f32 %v254_v38, %v254_v38  ;;  %v262_v47 = vsub.f32 %v251_v20, %v254_v38  ;;  %v1304_v20 = vld [vmem:[#allocation5 + $0x68] sm:$0xff]  }
 0x1f8   :  { %v257_v39 = vpop.xlane.xlu0 %256 }
 0x1f9   :  { %v258_v41 = vmul.f32 0.03125, %v257_v39 }
 0x1fb   :  { %v260_v42 = vsub.f32 %v258_v41, %v259_v40  ;;  %v1307_v41 = vld [vmem:[#allocation7 + $0x40] sm:$0xff]  }
 0x1fd   :  { %v261_v43 = vmax.f32 %v260_v42, 0.0  ;;  %v1719_v42 = vld [vmem:[#allocation10 + $0x8] sm:$0xff] }
 0x1ff   :  { %v263_v44 = vadd.f32 1e-05, %v261_v43  ;;  %v545_v43 = vrot.slane %v1719_v42, %v161_v13  ;;  %v1311_v13 = vld [vmem:[#allocation7 + $0x60] sm:$0xff]  }
 0x201   :  { %1331 = vrsqrt.f32 %v263_v44 }
 0x20b   :  { %v1332_v49 = vpop.eup %1331 }
 0x20c   :  { %v265_v50 = vmul.f32 %v1332_v49, %v262_v47 }
 0x20e   :  { %v270_v52 = vmul.f32 %v269_v48, %v265_v50 }
 0x210   :  { %v275_v53 = vadd.f32 %v274_v51, %v270_v52  ;;  %v1308_v52 = vld [vmem:[#allocation7 + $0x48] sm:$0xff]  }
 0x212   :  { %v276_v54 = vpack.c.bf16 %v275_v53, %v275_v53 }
 0x214   :  { %1159 = vmatmul.mubr.bf16.vlgmr.msra.gmra.mrb[0].mxu1 %v276_v54  ;;  %v1310_v54 = vld [vmem:[#allocation7 + $0x58] sm:$0xff]  }
 0x215   :  { %1198 = vmatprep.mubr.msk.bf16.mxu1 %vm1514_vm0, %v1513_v0  ;;  %1183 = vmatpush3.bf16.msra.mxu1 %v1299_v15  ;;  %v652_v15 = vrot.slane %v1719_v42, %v268_v45  ;;  %v663_v45 = vrot.slane %v1719_v42, %v279_v57 }
 0x216   :  { %1184 = vmatprep.subr.bf16.mxu1 %v1513_v0 }
 0x219   :  { %1185 = vmatpush3.bf16.msra.mxu1 %v1300_v16 }
 0x21a   :  { %1186 = vmatprep.subr.bf16.mxu1 %v1513_v0 }
 0x21d   :  { %1187 = vmatpush3.bf16.msra.mxu1 %v1301_v17 }
 0x21e   :  { %1188 = vmatprep.subr.bf16.mxu1 %v1513_v0 }
 0x221   :  { %1189 = vmatpush3.bf16.msra.mxu1 %v1302_v18  ;;  %v657_v18 = vrot.slane %v1719_v42, %v273_v46 }
 0x222   :  { %1190 = vmatprep.subr.bf16.mxu1 %v1513_v0 }
 0x225   :  { %1191 = vmatpush3.bf16.msra.mxu1 %v1303_v19 }
 0x226   :  { %1192 = vmatprep.subr.bf16.mxu1 %v1513_v0 }
 0x229   :  { %1193 = vmatpush3.bf16.msra.mxu1 %v1304_v20 }
 0x22a   :  { %1194 = vmatprep.subr.bf16.mxu1 %v1513_v0 }
 0x22d   :  { %1195 = vmatpush3.bf16.msra.mxu1 %v1305_v21 }
 0x22e   :  { %1196 = vmatprep.subr.bf16.mxu1 %v1513_v0 }
 0x231   :  { %1197 = vmatpush3.bf16.msra.mxu1 %v1306_v22  ;;  %v1321_v22 = vld [vmem:[#allocation8 + $0x70] sm:$0xff]  }
 0x232   :  { %1222 = vmatprep.subr.bf16.mxu1 %v1513_v0 }
 0x2e7   :  { %v363_v59 = vpop.f32.mrb[0].mxu1 }
 0x2e8   :  { %v364_v60 = vadd.f32 %v363_v59, %v280_v58  ;;  %v1160_v61 = vpop.f32.mrb[1].mxu1  ;;  %v1314_v58 = vld [vmem:[#allocation7 + $0x78] sm:$0xff]   ;;  %v1315_v59 = vld [vmem:[#allocation8 + $0x40] sm:$0xff]  }
 0x2e9   :  { %v366_v62 = vpop.f32.mrb[2].mxu1  ;;  %v1317_v61 = vld [vmem:[#allocation8 + $0x50] sm:$0xff]  }
 0x2ea   :  { %v369_v63 = vmax.f32 %v364_v60, 0.0  ;;  %v1161_v1 = vpop.f32.mrb[3].mxu1  ;;  %v1316_v60 = vld [vmem:[#allocation8 + $0x48] sm:$0xff]   ;;  %v1318_v62 = vld [vmem:[#allocation8 + $0x58] sm:$0xff]  }
 0x2eb   :  { %v1320_v1 = vld [vmem:[#allocation8 + $0x68] sm:$0xff]  }
 0x2ec   :  { %v370_v2 = vpack.c.bf16 %v369_v63, %v369_v63  ;;  %v1319_v63 = vld [vmem:[#allocation8 + $0x60] sm:$0xff]  }
 0x2ee   :  { %1179 = vmatmul.mubr.bf16.vlgmr.msra.gmra.mrb[4].mxu0 %v370_v2 }
 0x2ef   :  { %1218 = vmatprep.mubr.msk.bf16.mxu0 %vm1514_vm0, %v1513_v0  ;;  %1203 = vmatpush3.bf16.msra.mxu0 %v1307_v41  ;;  %v1325_v41 = vld [vmem:[#allocation11 + $0x10] sm:$0xff]  }
 0x2f0   :  { %1204 = vmatprep.subr.bf16.mxu0 %v1513_v0 }
 0x2f3   :  { %1205 = vmatpush3.bf16.msra.mxu0 %v1308_v52 }
 0x2f4   :  { %1206 = vmatprep.subr.bf16.mxu0 %v1513_v0 }
 0x3c1   :  { %v457_v5 = vpop.f32.mrb[4].mxu0 }
 0x3c2   :  { %v458_v6 = vadd.f32 %v457_v5, %v374_v4  ;;  %v1180_v7 = vpop.f32.mrb[5].mxu0 }
 0x3c3   :  { %v460_v8 = vpop.f32.mrb[6].mxu0 }
 0x3c4   :  { %v463_v9 = vadd.f32 %v458_v6, %v275_v53  ;;  %v1181_v10 = vpop.f32.mrb[7].mxu0  ;;  %v1309_v53 = vld [vmem:[#allocation7 + $0x50] sm:$0xff]  }
 0x3c5   :  { %1207 = vmatpush3.bf16.msra.mxu0 %v1309_v53 }
 0x3c6   :  { %464 = vadd.xlane.f32.xlu1 %v463_v9  ;;  %v467_v11 = vmul.f32 %v463_v9, %v463_v9  ;;  %1208 = vmatprep.subr.bf16.mxu0 %v1513_v0 }
 0x3c9   :  { %1209 = vmatpush3.bf16.msra.mxu0 %v1310_v54 }
 0x3ca   :  { %468 = vadd.xlane.f32.xlu1 %v467_v11  ;;  %1210 = vmatprep.subr.bf16.mxu0 %v1513_v0 }
 0x3cd   :  { %1211 = vmatpush3.bf16.msra.mxu0 %v1311_v13 }
 0x3ce   :  { %1212 = vmatprep.subr.bf16.mxu0 %v1513_v0 }
 0x3d1   :  { %1213 = vmatpush3.bf16.msra.mxu0 %v1312_v55 }
 0x3d2   :  { %1214 = vmatprep.subr.bf16.mxu0 %v1513_v0 }
 0x3d5   :  { %1215 = vmatpush3.bf16.msra.mxu0 %v1313_v56  ;;  %v864_v56 = vrot.slane %v1719_v42, %v480_v31 }
 0x3d6   :  { %1216 = vmatprep.subr.bf16.mxu0 %v1513_v0 }
 0x3d9   :  { %1217 = vmatpush3.bf16.msra.mxu0 %v1314_v58 }
 0x3da   :  { %1242 = vmatprep.subr.bf16.mxu0 %v1513_v0 }
 0x453   :  { %v465_v23 = vpop.xlane.xlu1 %464 }
 0x454   :  { %v466_v24 = vmul.f32 0.03125, %v465_v23  ;;  %v1322_v23 = vld [vmem:[#allocation8 + $0x78] sm:$0xff]  }
 0x456   :  { %v471_v26 = vmul.f32 %v466_v24, %v466_v24  ;;  %v474_v33 = vsub.f32 %v463_v9, %v466_v24 }
 0x457   :  { %v469_v25 = vpop.xlane.xlu1 %468 }
 0x458   :  { %v470_v27 = vmul.f32 0.03125, %v469_v25 }
 0x45a   :  { %v472_v28 = vsub.f32 %v470_v27, %v471_v26 }
 0x45c   :  { %v473_v29 = vmax.f32 %v472_v28, 0.0 }
 0x45e   :  { %v475_v30 = vadd.f32 1e-05, %v473_v29 }
 0x460   :  { %1333 = vrsqrt.f32 %v475_v30  ;;  %v1323_v30 = vld [vmem:[#allocation11] sm:$0xff]  }
 0x46a   :  { %v1334_v35 = vpop.eup %1333 }
 0x46b   :  { %v477_v36 = vmul.f32 %v1334_v35, %v474_v33  ;;  %v757_v33 = vrot.slane %v1719_v42, %v373_v3  ;;  %v1327_v3 = vld [vmem:[#allocation11 + $0x20] sm:$0xff]  }
 0x46d   :  { %v482_v38 = vmul.f32 %v481_v34, %v477_v36 }
 0x46f   :  { %v487_v39 = vadd.f32 %v486_v37, %v482_v38 }
 0x471   :  { %v541_v40 = vpack.c.bf16 %v487_v39, %v487_v39 }
 0x473   :  { %1199 = vmatmul.mubr.bf16.vlgmr.msra.gmra.mrb[4].mxu1 %v541_v40  ;;  %v1324_v40 = vld [vmem:[#allocation11 + $0x8] sm:$0xff]  }
 0x474   :  { %1238 = vmatprep.mubr.msk.bf16.mxu1 %vm1514_vm0, %v1513_v0  ;;  %1223 = vmatpush3.bf16.msra.mxu1 %v1315_v59 }
 0x475   :  { %1224 = vmatprep.subr.bf16.mxu1 %v1513_v0 }
 0x478   :  { %1225 = vmatpush3.bf16.msra.mxu1 %v1316_v60 }
 0x479   :  { %1226 = vmatprep.subr.bf16.mxu1 %v1513_v0 }
 0x47c   :  { %1227 = vmatpush3.bf16.msra.mxu1 %v1317_v61 }
 0x47d   :  { %1228 = vmatprep.subr.bf16.mxu1 %v1513_v0 }
 0x480   :  { %1229 = vmatpush3.bf16.msra.mxu1 %v1318_v62 }
 0x481   :  { %1230 = vmatprep.subr.bf16.mxu1 %v1513_v0 }
 0x484   :  { %1231 = vmatpush3.bf16.msra.mxu1 %v1319_v63  ;;  %v1050_v63 = vld [vmem:[%s1786_s6] ss:$0 sm:$0xff] }
 0x485   :  { %1232 = vmatprep.subr.bf16.mxu1 %v1513_v0 }
 0x488   :  { %1233 = vmatpush3.bf16.msra.mxu1 %v1320_v1 }
 0x489   :  { %1234 = vmatprep.subr.bf16.mxu1 %v1513_v0 }
 0x48c   :  { %1235 = vmatpush3.bf16.msra.mxu1 %v1321_v22 }
 0x48d   :  { %1236 = vmatprep.subr.bf16.mxu1 %v1513_v0 }
 0x490   :  { %1237 = vmatpush3.bf16.msra.mxu1 %v1322_v23 }
 0x546   :  { %v628_v44 = vpop.f32.mrb[4].mxu1 }
 0x547   :  { %v629_v47 = vadd.f32 %v628_v44, %v545_v43  ;;  %v1200_v14 = vpop.f32.mrb[5].mxu1  ;;  %v1326_v43 = vld [vmem:[#allocation11 + $0x18] sm:$0xff]   ;;  %v1328_v44 = vld [vmem:[#allocation11 + $0x28] sm:$0xff]  }
 0x548   :  { %v631_v48 = vpop.f32.mrb[6].mxu1  ;;  %v1330_v14 = vld [vmem:[#allocation11 + $0x38] sm:$0xff]  }
 0x549   :  { %v634_v49 = vadd.f32 %v629_v47, %v487_v39  ;;  %v1201_v50 = vpop.f32.mrb[7].mxu1  ;;  %v1329_v47 = vld [vmem:[#allocation11 + $0x30] sm:$0xff]  }
 0x54b   :  { %635 = vadd.xlane.f32.xlu0 %v634_v49  ;;  %v638_v51 = vmul.f32 %v634_v49, %v634_v49 }
 0x54d   :  { %639 = vadd.xlane.f32.xlu1 %v638_v51 }
 0x5d8   :  { %v636_v2 = vpop.xlane.xlu0 %635 }
 0x5d9   :  { %v637_v4 = vmul.f32 0.03125, %v636_v2 }
 0x5da   :  { %v640_v5 = vpop.xlane.xlu1 %639 }
 0x5db   :  { %v642_v6 = vmul.f32 %v637_v4, %v637_v4  ;;  %v641_v7 = vmul.f32 0.03125, %v640_v5  ;;  %v645_v11 = vsub.f32 %v634_v49, %v637_v4 }
 0x5dd   :  { %v643_v8 = vsub.f32 %v641_v7, %v642_v6 }
 0x5df   :  { %v644_v9 = vmax.f32 %v643_v8, 0.0 }
 0x5e1   :  { %v646_v10 = vadd.f32 1e-05, %v644_v9 }
 0x5e3   :  { %1335 = vrsqrt.f32 %v646_v10 }
 0x5ed   :  { %v1336_v16 = vpop.eup %1335 }
 0x5ee   :  { %v648_v17 = vmul.f32 %v1336_v16, %v645_v11 }
 0x5f0   :  { %v653_v19 = vmul.f32 %v652_v15, %v648_v17 }
 0x5f2   :  { %v658_v20 = vadd.f32 %v657_v18, %v653_v19 }
 0x5f4   :  { %v659_v21 = vpack.c.bf16 %v658_v20, %v658_v20 }
 0x5f6   :  { %1219 = vmatmul.mubr.bf16.vlgmr.msra.gmra.mrb[8].mxu0 %v659_v21 }
 0x5f7   :  { %1258 = vmatprep.mubr.msk.bf16.mxu0 %vm1514_vm0, %v1513_v0  ;;  %1243 = vmatpush3.bf16.msra.mxu0 %v1323_v30 }
 0x5f8   :  { %1244 = vmatprep.subr.bf16.mxu0 %v1513_v0 }
 0x5fb   :  { %1245 = vmatpush3.bf16.msra.mxu0 %v1324_v40 }
 0x5fc   :  { %1246 = vmatprep.subr.bf16.mxu0 %v1513_v0 }
 0x5ff   :  { %1247 = vmatpush3.bf16.msra.mxu0 %v1325_v41 }
 0x600   :  { %1248 = vmatprep.subr.bf16.mxu0 %v1513_v0 }
 0x603   :  { %1249 = vmatpush3.bf16.msra.mxu0 %v1326_v43 }
 0x604   :  { %1250 = vmatprep.subr.bf16.mxu0 %v1513_v0 }
 0x607   :  { %1251 = vmatpush3.bf16.msra.mxu0 %v1327_v3 }
 0x608   :  { %1252 = vmatprep.subr.bf16.mxu0 %v1513_v0 }
 0x60b   :  { %1253 = vmatpush3.bf16.msra.mxu0 %v1328_v44 }
 0x60c   :  { %1254 = vmatprep.subr.bf16.mxu0 %v1513_v0 }
 0x60f   :  { %1255 = vmatpush3.bf16.msra.mxu0 %v1329_v47 }
 0x610   :  { %1256 = vmatprep.subr.bf16.mxu0 %v1513_v0  ;;  %v869_v0 = vrot.slane %v1719_v42, %v485_v32 }
 0x613   :  { %1257 = vmatpush3.bf16.msra.mxu0 %v1330_v14 }
 0x6c9   :  { %v746_v24 = vpop.f32.mrb[8].mxu0 }
 0x6ca   :  { %v747_v25 = vadd.f32 %v746_v24, %v663_v45  ;;  %v1220_v46 = vpop.f32.mrb[9].mxu0 }
 0x6cb   :  { %v749_v26 = vpop.f32.mrb[10].mxu0 }
 0x6cc   :  { %v752_v27 = vmax.f32 %v747_v25, 0.0  ;;  %v1221_v28 = vpop.f32.mrb[11].mxu0 }
 0x6ce   :  { %v753_v29 = vpack.c.bf16 %v752_v27, %v752_v27 }
 0x6d0   :  { %1239 = vmatmul.mubr.bf16.vlgmr.msra.gmra.mrb[8].mxu1 %v753_v29 }
 0x7a3   :  { %v840_v34 = vpop.f32.mrb[8].mxu1 }
 0x7a4   :  { %v841_v35 = vadd.f32 %v840_v34, %v757_v33  ;;  %v1240_v36 = vpop.f32.mrb[9].mxu1 }
 0x7a5   :  { %v843_v57 = vpop.f32.mrb[10].mxu1 }
 0x7a6   :  { %v846_v37 = vadd.f32 %v841_v35, %v658_v20  ;;  %v1241_v38 = vpop.f32.mrb[11].mxu1 }
 0x7a8   :  { %847 = vadd.xlane.f32.xlu0 %v846_v37  ;;  %v850_v39 = vmul.f32 %v846_v37, %v846_v37 }
 0x7aa   :  { %851 = vadd.xlane.f32.xlu1 %v850_v39 }
 0x835   :  { %v848_v48 = vpop.xlane.xlu0 %847 }
 0x836   :  { %v849_v49 = vmul.f32 0.03125, %v848_v48 }
 0x837   :  { %v852_v50 = vpop.xlane.xlu1 %851 }
 0x838   :  { %v854_v51 = vmul.f32 %v849_v49, %v849_v49  ;;  %v853_v52 = vmul.f32 0.03125, %v852_v50  ;;  %v857_v55 = vsub.f32 %v846_v37, %v849_v49 }
 0x83a   :  { %v855_v53 = vsub.f32 %v853_v52, %v854_v51 }
 0x83c   :  { %v856_v54 = vmax.f32 %v855_v53, 0.0 }
 0x83e   :  { %v858_v13 = vadd.f32 1e-05, %v856_v54 }
 0x840   :  { %1337 = vrsqrt.f32 %v858_v13 }
 0x84a   :  { %v1338_v58 = vpop.eup %1337 }
 0x84b   :  { %v860_v59 = vmul.f32 %v1338_v58, %v857_v55 }
 0x84d   :  { %v865_v60 = vmul.f32 %v864_v56, %v860_v59 }
 0x84f   :  { %v870_v61 = vadd.f32 %v869_v0, %v865_v60 }
 0x851   :  { %v871_v62 = vpack.c.bf16 %v870_v61, %v870_v61 }
 0x853   :  { %1259 = vmatmul.mubr.bf16.vlgmr.msra.gmra.mrb[12].mxu0 %v871_v62 }
 0x926   :  { %v977_v1 = vpop.f32.mrb[12].mxu0 }
 0x927   :  { %v978_v2 = vadd.f32 %v1050_v63, %v977_v1  ;;  %v1260_v4 = vpop.f32.mrb[13].mxu0 }
 0x928   :  { %v980_v31 = vpop.f32.mrb[14].mxu0 }
 0x929   :  { %983 = vst [vmem:[#allocation13] sm:$0xff] %v978_v2  ;;  %v1261_v5 = vpop.f32.mrb[15].mxu0 }
 0x92a   :  { %1482 = shalt.err (!%p1479_p10)
}
 0x92b   :  { %s1483_s6 = scalar_lea.hbm %s1787_s7, 128 }
 0x92c   :  { %p1484_p11 = scmp.ne.s32.totalorder %s1787_s7, %s1483_s6  ;;  %p1487_p12 = scmp.lt.u32.totalorder %s1483_s6, %s1787_s7 }
 0x92e   :  { %p1489_p13 = pnand %p1487_p12, %p1484_p11 }
 0x930   :  { %1492 = shalt.err (!%p1489_p13)
}
 0x931   :  { %993 = dma.vmem_to_hbm [thread:$0]  %s991_s18, 128, %s1787_s7, [#allocation4]  }
 0x932   :  { %1501 = dma.done.wait [#allocation4], 128  }
 0x933   :  { %1502 = vsyncadd [#allocation4], 4294967168 }
 0x934   :  { %997 = vsyncpa [#allocation3], 1 }
 0x935   :  { %998 = vsyncpa [#allocation6], 1 }
 0x936   :  { %999 = vsyncpa [#allocation9], 1 }
 0x937   :  { %1000 = vsyncpa [#allocation12], 1 }
 0x938   :  { %1001 = vsyncpa [#allocation4], 1 }

</bundles_post_ra>
